<compile_context>
chip_gen: v7x
topology: tpu7x:2x2x1
jax: 0.10.0
libtpu: 0.0.40
codegen_flags: <defaults>
</compile_context>

<pallas_src>
import functools

import jax
import jax.numpy as jnp
import numpy as np
from jax.experimental import pallas as pl
from jax.experimental.pallas import tpu as pltpu

C_IN = 24 + 4 + 3          # 31
C1, C2, C3 = 32, 48, 64
BN_EPS = 1e-5


def anchor_point_kernel(x_ref, w1_ref, b1_ref, w2_ref, b2_ref, w3_ref, b3_ref,
                        wab_ref, out_ref, *, approx_recip):
    TB, N, Cin = x_ref.shape
    M = TB * N
    dt = w1_ref.dtype                      # MXU operand dtype (f32 or bf16)

    # Flatten the batch tile so the 1x1-conv stack runs as one (TB*N, C) matmul chain.
    # This (and the reshapes below) is layout-free when N % 8 == 0 (sublane aligned).
    # TODO(synk): for N % 8 != 0 these reshapes materialize a per-step VMEM relayout copy;
    # pad N upstream if that case matters.
    x = x_ref[...].reshape(M, Cin).astype(dt)

    # conv1/2/3 (kernel_size=1) + folded BatchNorm + ReLU.  f32 accumulation on the MXU;
    # bias add + ReLU in f32 on the VPU (so this also works on v5e, which has no bf16 VPU).
    h = jnp.dot(x, w1_ref[...], preferred_element_type=jnp.float32) + b1_ref[...]
    h = jnp.maximum(h, 0.0)
    h = jnp.dot(h.astype(dt), w2_ref[...], preferred_element_type=jnp.float32) + b2_ref[...]
    h = jnp.maximum(h, 0.0)
    h = jnp.dot(h.astype(dt), w3_ref[...], preferred_element_type=jnp.float32) + b3_ref[...]
    h3 = jnp.maximum(h, 0.0)                                   # (M, 64) f32

    # Attention logit per point via one extra (M,64)x(64,64) MXU matmul against a
    # lane-replicated attn weight (wab[k, j] = wa[k]): the logit comes out of the MXU already
    # broadcast across the 64-lane axis, so the softmax and the weighted sum run entirely in
    # h3's native N-on-sublane layout (no lane<->sublane transposes of e on the vec path).
    # The attn Linear bias is dropped: softmax is invariant to a per-row constant.
    logit = jnp.dot(h3.astype(dt), wab_ref[...], preferred_element_type=jnp.float32)  # (M,64)

    lg = logit.reshape(TB, N, C3)
    m = jnp.max(lg, axis=1, keepdims=True)                     # (TB, 1, 64) sublane reduce
    e = jnp.exp(lg - m)                                        # (TB, N, 64)
    s = jnp.sum(e, axis=1, keepdims=True)                      # (TB, 1, 64)
    inv = pl.reciprocal(s, approx=True) if approx_recip else 1.0 / s

    # Attention-weighted sum over points: VPU multiply + XLU sublane reduce
    # (no TB batched M=1 MXU matmuls, which would pay MXU fill + result-FIFO pop each).
    h3r = h3.reshape(TB, N, C3)
    vec = jnp.sum(h3r * e, axis=1) * inv.reshape(TB, C3)       # (TB, 64)

    # Attention weights for the second output: one replicated lane column, moved to the lane
    # axis -- the only (tiny) lane<->sublane relayout in the kernel.
    attn = e[:, :, 0] * inv[:, :, 0]                           # (TB, N)

    # Single lane-dense output slab (vec | attn): one store pipeline instead of two narrow
    # (64- and N-wide) outputs.
    out_ref[...] = jnp.concatenate([vec, attn], axis=-1).astype(out_ref.dtype)


def _pick_tb(batch, n, x_itemsize, target_x_tile_bytes, tb_cap):
    """Batch-tile size: big enough that the x tile is a few MiB (amortizes the ~0.35 us
    per-step overhead), small enough to bound the per-step VMEM working set, and giving
    >= 2 grid steps for moderate/large batches so ("parallel",) can use both TensorCores
    on 2-TC parts (v7x)."""
    row_bytes = max(1, n * C_IN * x_itemsize)
    tb = max(8, min(int(target_x_tile_bytes // row_bytes), tb_cap))
    if batch >= 16:
        half = -(-((batch + 1) // 2) // 8) * 8        # ceil(B/2) rounded up to 8
        tb = min(tb, half)
    if tb >= batch:
        return batch                                  # single full-batch step (block == full dim)
    return max(8, (tb // 8) * 8)                      # 8-aligned so the (TB, 64+N) out block tiles


def anchor_point_net(x, params, *, compute_dtype=jnp.float32, approx_recip=True,
                     target_x_tile_bytes=4 << 20, tb_cap=2048):
    """x: (B, N, 31).  Returns (attn_vec (B, 64) f32, attn_weights (B, N, 1) f32).

    x is DMA'd as-is: no wrapper-side channel/batch padding or dtype-cast passes over it; the
    MXU-operand cast happens per tile in VMEM.  Passing bf16 x (with compute_dtype=bf16) also
    halves the x DMA bytes -- recommended on v5e/v6e/v7x alike (accumulation stays f32).
    """
    B, N, Cin = x.shape
    assert Cin == C_IN
    w1, b1, w2, b2, w3, b3, wa, _ba = params          # _ba is softmax-invariant: dropped
    cd = jnp.dtype(compute_dtype)

    TB = _pick_tb(B, N, jnp.dtype(x.dtype).itemsize, target_x_tile_bytes, tb_cap)
    grid = (pl.cdiv(B, TB),)
    # If TB does not divide B, the last block's out-of-range rows read unspecified data; all
    # computation is row-independent along the batch axis and those output rows are discarded,
    # so this is safe (and avoids a batch-pad copy of x).

    # Tiny weights: cast once.  The attn Linear weight is folded into a lane-replicated
    # (64, 64) matrix so its matmul output is already broadcast across lanes.
    w1c, w2c, w3c = (w.astype(cd) for w in (w1, w2, w3))
    wab = jnp.broadcast_to(jnp.reshape(wa, (C3, 1)), (C3, C3)).astype(cd)

    kernel = functools.partial(anchor_point_kernel, approx_recip=approx_recip)
    const = lambda a: pl.BlockSpec(a.shape, lambda b: (0,) * a.ndim)

    out = pl.pallas_call(
        kernel,
        out_shape=jax.ShapeDtypeStruct((B, C3 + N), jnp.float32),
        grid_spec=pltpu.PrefetchScalarGridSpec(
            num_scalar_prefetch=0,
            grid=grid,
            in_specs=[
                pl.BlockSpec((TB, N, Cin), lambda b: (b, 0, 0)),    # x batch tile (K=31, unpadded)
                const(w1c), const(b1), const(w2c), const(b2),       # weights stay
                const(w3c), const(b3), const(wab),                  # VMEM-resident
            ],
            out_specs=pl.BlockSpec((TB, C3 + N), lambda b: (b, 0)),
        ),
        compiler_params=pltpu.CompilerParams(
            dimension_semantics=("parallel",),
            # v5e scoped-VMEM default is 16 MiB and v6e/v7x 32 MiB -- too small for multi-MiB
            # x tiles plus f32 intermediates.  56 MiB stays under v7x's 64 MiB physical VMEM.
            vmem_limit_bytes=56 * 1024 * 1024,
        ),
    )(x, w1c, b1, w2c, b2, w3c, b3, wab)

    # Split the slab into the module's two outputs.
    # TODO(synk): a fused downstream consumer should take the (B, 64+N) slab directly and skip
    # this extra pass over the (small) outputs.
    return out[:, :C3], out[:, C3:, None]


def fold_bn(conv_w, conv_b, gamma, beta, mean, var):
    """Fold Conv1d(k=1) + BatchNorm1d (inference) into W (Cin,Cout) and b (1,Cout)."""
    scale = gamma / jnp.sqrt(var + BN_EPS)               # (Cout,)
    w = conv_w * scale[:, None]                          # (Cout, Cin)
    b = scale * (conv_b - mean) + beta                   # (Cout,)
    return w.T.astype(jnp.float32), b[None, :].astype(jnp.float32)


def make_params():
    """Deterministic synthetic parameters with the shapes from __init__."""
    keys = jax.random.split(jax.random.PRNGKey(0), 16)

    def uni(key, shape, fan_in):
        bound = 1.0 / np.sqrt(fan_in)
        return jax.random.uniform(key, shape, jnp.float32, -bound, bound)

    # conv1: 31 -> 32
    cw1 = uni(keys[0], (C1, C_IN), C_IN); cb1 = uni(keys[1], (C1,), C_IN)
    g1 = jnp.linspace(0.8, 1.2, C1); be1 = jnp.linspace(-0.1, 0.1, C1)
    m1 = jnp.linspace(-0.05, 0.05, C1); v1 = jnp.linspace(0.9, 1.1, C1)
    # conv2: 32 -> 48
    cw2 = uni(keys[2], (C2, C1), C1); cb2 = uni(keys[3], (C2,), C1)
    g2 = jnp.linspace(0.9, 1.1, C2); be2 = jnp.linspace(-0.05, 0.05, C2)
    m2 = jnp.linspace(-0.02, 0.02, C2); v2 = jnp.linspace(0.95, 1.05, C2)
    # conv3: 48 -> 64
    cw3 = uni(keys[4], (C3, C2), C2); cb3 = uni(keys[5], (C3,), C2)
    g3 = jnp.linspace(0.85, 1.15, C3); be3 = jnp.linspace(-0.08, 0.08, C3)
    m3 = jnp.linspace(-0.03, 0.03, C3); v3 = jnp.linspace(0.92, 1.08, C3)
    # attn: Linear(64 -> 1)
    aw = uni(keys[6], (1, C3), C3); ab = uni(keys[7], (1,), C3)

    w1, b1 = fold_bn(cw1, cb1, g1, be1, m1, v1)
    w2, b2 = fold_bn(cw2, cb2, g2, be2, m2, v2)
    w3, b3 = fold_bn(cw3, cb3, g3, be3, m3, v3)
    wa = aw.astype(jnp.float32)            # (1, 64)
    ba = ab[None, :].astype(jnp.float32)   # (1, 1)
    return (w1, b1, w2, b2, w3, b3, wa, ba)


def reference_forward(x, params):
    """Pure-JAX reference with identical semantics (for correctness checks)."""
    w1, b1, w2, b2, w3, b3, wa, ba = params
    h = jnp.maximum(x @ w1 + b1, 0.0)
    h = jnp.maximum(h @ w2 + b2, 0.0)
    h = jnp.maximum(h @ w3 + b3, 0.0)                    # (B, N, 64)
    logits = h @ wa.T + ba                               # (B, N, 1)
    w = jax.nn.softmax(logits, axis=1)
    vec = jnp.sum(h * w, axis=1)                         # (B, 64)
    return vec, w


if __name__ == "__main__":
    params = make_params()

    # Small shapes consistent with the module.
    B, N = 2, 8
    x = jax.random.normal(jax.random.PRNGKey(0), (B, N, C_IN), jnp.float32)
    vec_ref, attn_w_ref = reference_forward(x, params)

    # Exact f32 path (approx reciprocal off) -- tight check against the JAX reference.
    vec, attn = anchor_point_net(x, params, compute_dtype=jnp.float32, approx_recip=False)
    vec, attn = jax.block_until_ready((vec, attn))
    np.testing.assert_allclose(np.asarray(vec), np.asarray(vec_ref), rtol=1e-5, atol=1e-5)
    np.testing.assert_allclose(np.asarray(attn), np.asarray(attn_w_ref), rtol=1e-5, atol=1e-5)
    assert vec.shape == (B, C3) and attn.shape == (B, N, 1)

    # Default perf config: EUP approx reciprocal for the softmax denominator (f32 elsewhere).
    vec_a, attn_a = anchor_point_net(x, params)
    vec_a, attn_a = jax.block_until_ready((vec_a, attn_a))
    np.testing.assert_allclose(np.asarray(vec_a), np.asarray(vec_ref), rtol=1e-2, atol=1e-2)
    np.testing.assert_allclose(np.asarray(attn_a), np.asarray(attn_w_ref), rtol=1e-2, atol=1e-2)

    # bf16 MXU-operand path (recommended on v5e/v6e/v7x); f32 accumulation, looser tolerance.
    vec_bf, attn_bf = anchor_point_net(x, params, compute_dtype=jnp.bfloat16)
    vec_bf, attn_bf = jax.block_until_ready((vec_bf, attn_bf))
    np.testing.assert_allclose(np.asarray(vec_bf), np.asarray(vec_ref), rtol=5e-2, atol=5e-2)
    np.testing.assert_allclose(np.asarray(attn_bf), np.asarray(attn_w_ref), rtol=5e-2, atol=5e-2)

    # Multi-step grid with a partial last batch block (B=20, TB=8 -> grid=3, last block ragged).
    B2 = 20
    x2 = jax.random.normal(jax.random.PRNGKey(1), (B2, N, C_IN), jnp.float32)
    vec2_ref, attn2_ref = reference_forward(x2, params)
    vec2, attn2 = anchor_point_net(x2, params, approx_recip=False, tb_cap=8)
    vec2, attn2 = jax.block_until_ready((vec2, attn2))
    np.testing.assert_allclose(np.asarray(vec2), np.asarray(vec2_ref), rtol=1e-5, atol=1e-5)
    np.testing.assert_allclose(np.asarray(attn2), np.asarray(attn2_ref), rtol=1e-5, atol=1e-5)

    print("KERNEL_OK")
</pallas_src>

<mosaic_0001>
module attributes {stable_mosaic.version = 11 : i64} {
  func.func @anchor_point_kernel(%arg0: i32, %arg1: memref<2x8x31xf32, #tpu.memory_space<vmem>>, %arg2: memref<31x32xf32, #tpu.memory_space<vmem>>, %arg3: memref<1x32xf32, #tpu.memory_space<vmem>>, %arg4: memref<32x48xf32, #tpu.memory_space<vmem>>, %arg5: memref<1x48xf32, #tpu.memory_space<vmem>>, %arg6: memref<48x64xf32, #tpu.memory_space<vmem>>, %arg7: memref<1x64xf32, #tpu.memory_space<vmem>>, %arg8: memref<64x64xf32, #tpu.memory_space<vmem>>, %arg9: memref<2x72xf32, #tpu.memory_space<vmem>>) attributes {dimension_semantics = [#tpu.dimension_semantics<parallel>], iteration_bounds = array<i64: 1>, scalar_prefetch = 0 : i64, scratch_operands = 0 : i64, tpu.core_type = #tpu.core_type<tc>, window_params = [{transform_indices = @transform_0, window_bounds = array<i64: 2, 8, 31>}, {pipeline_mode = #tpu.pipeline_mode<synchronous>, transform_indices = @transform_1, window_bounds = array<i64: 31, 32>}, {pipeline_mode = #tpu.pipeline_mode<synchronous>, transform_indices = @transform_2, window_bounds = array<i64: 1, 32>}, {pipeline_mode = #tpu.pipeline_mode<synchronous>, transform_indices = @transform_3, window_bounds = array<i64: 32, 48>}, {pipeline_mode = #tpu.pipeline_mode<synchronous>, transform_indices = @transform_4, window_bounds = array<i64: 1, 48>}, {pipeline_mode = #tpu.pipeline_mode<synchronous>, transform_indices = @transform_5, window_bounds = array<i64: 48, 64>}, {pipeline_mode = #tpu.pipeline_mode<synchronous>, transform_indices = @transform_6, window_bounds = array<i64: 1, 64>}, {pipeline_mode = #tpu.pipeline_mode<synchronous>, transform_indices = @transform_7, window_bounds = array<i64: 64, 64>}, {transform_indices = @transform_8, window_bounds = array<i64: 2, 72>}]} {
    %c0 = arith.constant 0 : index
    %c0_0 = arith.constant 0 : index
    %c0_1 = arith.constant 0 : index
    %0 = vector.load %arg1[%c0, %c0_0, %c0_1] : memref<2x8x31xf32, #tpu.memory_space<vmem>>, vector<2x8x31xf32>
    %1 = vector.shape_cast %0 : vector<2x8x31xf32> to vector<16x31xf32>
    %c0_2 = arith.constant 0 : index
    %c0_3 = arith.constant 0 : index
    %2 = vector.load %arg2[%c0_2, %c0_3] : memref<31x32xf32, #tpu.memory_space<vmem>>, vector<31x32xf32>
    %cst = arith.constant dense<0.000000e+00> : vector<16x32xf32>
    %3 = tpu.matmul %1, %2, %cst {dimension_numbers = #tpu.dot_dimension_numbers<[1], [0], [0], [1], [0, 0, 1, 1], [], []>} : vector<16x31xf32>, vector<31x32xf32>, vector<16x32xf32> -> vector<16x32xf32>
    %c0_4 = arith.constant 0 : index
    %c0_5 = arith.constant 0 : index
    %4 = vector.load %arg3[%c0_4, %c0_5] : memref<1x32xf32, #tpu.memory_space<vmem>>, vector<1x32xf32>
    %5 = vector.broadcast %4 : vector<1x32xf32> to vector<16x32xf32>
    %6 = arith.addf %3, %5 : vector<16x32xf32>
    %cst_6 = arith.constant 0.000000e+00 : f32
    %7 = vector.broadcast %cst_6 : f32 to vector<16x32xf32>
    %8 = arith.maximumf %6, %7 : vector<16x32xf32>
    %c0_7 = arith.constant 0 : index
    %c0_8 = arith.constant 0 : index
    %9 = vector.load %arg4[%c0_7, %c0_8] : memref<32x48xf32, #tpu.memory_space<vmem>>, vector<32x48xf32>
    %cst_9 = arith.constant dense<0.000000e+00> : vector<16x48xf32>
    %10 = tpu.matmul %8, %9, %cst_9 {dimension_numbers = #tpu.dot_dimension_numbers<[1], [0], [0], [1], [0, 0, 1, 1], [], []>} : vector<16x32xf32>, vector<32x48xf32>, vector<16x48xf32> -> vector<16x48xf32>
    %c0_10 = arith.constant 0 : index
    %c0_11 = arith.constant 0 : index
    %11 = vector.load %arg5[%c0_10, %c0_11] : memref<1x48xf32, #tpu.memory_space<vmem>>, vector<1x48xf32>
    %12 = vector.broadcast %11 : vector<1x48xf32> to vector<16x48xf32>
    %13 = arith.addf %10, %12 : vector<16x48xf32>
    %cst_12 = arith.constant 0.000000e+00 : f32
    %14 = vector.broadcast %cst_12 : f32 to vector<16x48xf32>
    %15 = arith.maximumf %13, %14 : vector<16x48xf32>
    %c0_13 = arith.constant 0 : index
    %c0_14 = arith.constant 0 : index
    %16 = vector.load %arg6[%c0_13, %c0_14] : memref<48x64xf32, #tpu.memory_space<vmem>>, vector<48x64xf32>
    %cst_15 = arith.constant dense<0.000000e+00> : vector<16x64xf32>
    %17 = tpu.matmul %15, %16, %cst_15 {dimension_numbers = #tpu.dot_dimension_numbers<[1], [0], [0], [1], [0, 0, 1, 1], [], []>} : vector<16x48xf32>, vector<48x64xf32>, vector<16x64xf32> -> vector<16x64xf32>
    %c0_16 = arith.constant 0 : index
    %c0_17 = arith.constant 0 : index
    %18 = vector.load %arg7[%c0_16, %c0_17] : memref<1x64xf32, #tpu.memory_space<vmem>>, vector<1x64xf32>
    %19 = vector.broadcast %18 : vector<1x64xf32> to vector<16x64xf32>
    %20 = arith.addf %17, %19 : vector<16x64xf32>
    %cst_18 = arith.constant 0.000000e+00 : f32
    %21 = vector.broadcast %cst_18 : f32 to vector<16x64xf32>
    %22 = arith.maximumf %20, %21 : vector<16x64xf32>
    %c0_19 = arith.constant 0 : index
    %c0_20 = arith.constant 0 : index
    %23 = vector.load %arg8[%c0_19, %c0_20] : memref<64x64xf32, #tpu.memory_space<vmem>>, vector<64x64xf32>
    %cst_21 = arith.constant dense<0.000000e+00> : vector<16x64xf32>
    %24 = tpu.matmul %22, %23, %cst_21 {dimension_numbers = #tpu.dot_dimension_numbers<[1], [0], [0], [1], [0, 0, 1, 1], [], []>} : vector<16x64xf32>, vector<64x64xf32>, vector<16x64xf32> -> vector<16x64xf32>
    %25 = vector.shape_cast %24 : vector<16x64xf32> to vector<2x8x64xf32>
    %cst_22 = arith.constant dense<0xFF800000> : vector<2x64xf32>
    %26 = vector.multi_reduction <maximumf>, %25, %cst_22 [1] : vector<2x8x64xf32> to vector<2x64xf32>
    %27 = vector.shape_cast %26 : vector<2x64xf32> to vector<2x1x64xf32>
    %28 = vector.broadcast %27 : vector<2x1x64xf32> to vector<2x8x64xf32>
    %29 = arith.subf %25, %28 : vector<2x8x64xf32>
    %30 = math.exp %29 : vector<2x8x64xf32>
    %cst_23 = arith.constant dense<0.000000e+00> : vector<2x64xf32>
    %31 = vector.multi_reduction <add>, %30, %cst_23 [1] : vector<2x8x64xf32> to vector<2x64xf32>
    %32 = vector.shape_cast %31 : vector<2x64xf32> to vector<2x1x64xf32>
    %cst_24 = arith.constant 1.000000e+00 : f32
    %33 = vector.broadcast %cst_24 : f32 to vector<2x1x64xf32>
    %34 = arith.divf %33, %32 : vector<2x1x64xf32>
    %35 = vector.shape_cast %22 : vector<16x64xf32> to vector<2x8x64xf32>
    %36 = arith.mulf %35, %30 : vector<2x8x64xf32>
    %cst_25 = arith.constant dense<0.000000e+00> : vector<2x64xf32>
    %37 = vector.multi_reduction <add>, %36, %cst_25 [1] : vector<2x8x64xf32> to vector<2x64xf32>
    %38 = vector.shape_cast %34 : vector<2x1x64xf32> to vector<2x64xf32>
    %39 = arith.mulf %37, %38 : vector<2x64xf32>
    %40 = vector.extract_strided_slice %30 {offsets = [0, 0, 0], sizes = [2, 8, 1], strides = [1, 1, 1]} : vector<2x8x64xf32> to vector<2x8x1xf32>
    %41 = vector.shape_cast %40 : vector<2x8x1xf32> to vector<2x8xf32>
    %42 = vector.extract_strided_slice %34 {offsets = [0, 0, 0], sizes = [2, 1, 1], strides = [1, 1, 1]} : vector<2x1x64xf32> to vector<2x1x1xf32>
    %43 = vector.shape_cast %42 : vector<2x1x1xf32> to vector<2x1xf32>
    %44 = vector.broadcast %43 : vector<2x1xf32> to vector<2x8xf32>
    %45 = arith.mulf %41, %44 : vector<2x8xf32>
    %46 = tpu.concatenate %39, %45 in 1 : vector<2x64xf32>, vector<2x8xf32> -> vector<2x72xf32>
    %c0_26 = arith.constant 0 : index
    %c0_27 = arith.constant 0 : index
    %47 = vector.load %arg9[%c0_26, %c0_27] : memref<2x72xf32, #tpu.memory_space<vmem>>, vector<2x72xf32>
    tpu.vector_store %arg9[%c0_26, %c0_27], %46 {strides = array<i32>} : memref<2x72xf32, #tpu.memory_space<vmem>>, vector<2x72xf32>,
    return
  }
  func.func @transform_0(%arg0: i32) -> (i32, i32, i32) {
    %c0_i32 = arith.constant 0 : i32
    %c0_i32_0 = arith.constant 0 : i32
    %c0_i32_1 = arith.constant 0 : i32
    return %arg0, %c0_i32, %c0_i32_0 : i32, i32, i32
  }
  func.func @transform_1(%arg0: i32) -> (i32, i32) {
    %c0_i32 = arith.constant 0 : i32
    %c0_i32_0 = arith.constant 0 : i32
    %c0_i32_1 = arith.constant 0 : i32
    return %c0_i32, %c0_i32_0 : i32, i32
  }
  func.func @transform_2(%arg0: i32) -> (i32, i32) {
    %c0_i32 = arith.constant 0 : i32
    %c0_i32_0 = arith.constant 0 : i32
    %c0_i32_1 = arith.constant 0 : i32
    return %c0_i32, %c0_i32_0 : i32, i32
  }
  func.func @transform_3(%arg0: i32) -> (i32, i32) {
    %c0_i32 = arith.constant 0 : i32
    %c0_i32_0 = arith.constant 0 : i32
    %c0_i32_1 = arith.constant 0 : i32
    return %c0_i32, %c0_i32_0 : i32, i32
  }
  func.func @transform_4(%arg0: i32) -> (i32, i32) {
    %c0_i32 = arith.constant 0 : i32
    %c0_i32_0 = arith.constant 0 : i32
    %c0_i32_1 = arith.constant 0 : i32
    return %c0_i32, %c0_i32_0 : i32, i32
  }
  func.func @transform_5(%arg0: i32) -> (i32, i32) {
    %c0_i32 = arith.constant 0 : i32
    %c0_i32_0 = arith.constant 0 : i32
    %c0_i32_1 = arith.constant 0 : i32
    return %c0_i32, %c0_i32_0 : i32, i32
  }
  func.func @transform_6(%arg0: i32) -> (i32, i32) {
    %c0_i32 = arith.constant 0 : i32
    %c0_i32_0 = arith.constant 0 : i32
    %c0_i32_1 = arith.constant 0 : i32
    return %c0_i32, %c0_i32_0 : i32, i32
  }
  func.func @transform_7(%arg0: i32) -> (i32, i32) {
    %c0_i32 = arith.constant 0 : i32
    %c0_i32_0 = arith.constant 0 : i32
    %c0_i32_1 = arith.constant 0 : i32
    return %c0_i32, %c0_i32_0 : i32, i32
  }
  func.func @transform_8(%arg0: i32) -> (i32, i32) {
    %c0_i32 = arith.constant 0 : i32
    %c0_i32_0 = arith.constant 0 : i32
    return %arg0, %c0_i32 : i32, i32
  }
}

</mosaic_0001>

<bundles_post_ra>
// kernel: tpu_custom_call.1
= control target key start
LH: loop header
LB: loop body
LE: loop exit
PB: predicated region body
PF: predicated region fallthrough
CT: control target
= control target key end

     0   :  { %13 = vsyncpa [#allocation3], 0  ;;  %s1077_s0 = inlined_call_operand.hbm [shape: f32[2,8,31], index: 0, kind: input, shape index: {}]   ;;  %s1078_s1 = inlined_call_operand.hbm [shape: f32[31,32], index: 1, kind: input, shape index: {}]   ;;  %s1079_s2 = inlined_call_operand.vmem [shape: f32[1,32], index: 2, kind: input, shape index: {}]   ;;  %s1080_s3 = inlined_call_operand.hbm [shape: f32[32,48], index: 3, kind: input, shape index: {}]   ;;  %s1081_s4 = inlined_call_operand.vmem [shape: f32[1,48], index: 4, kind: input, shape index: {}]   ;;  %s1082_s5 = inlined_call_operand.hbm [shape: f32[48,64], index: 5, kind: input, shape index: {}]   ;;  %s1083_s6 = inlined_call_operand.vmem [shape: f32[1,64], index: 6, kind: input, shape index: {}]   ;;  %s1084_s7 = inlined_call_operand.hbm [shape: f32[64,64], index: 7, kind: input, shape index: {}]   ;;  %s1085_s8 = inlined_call_operand.hbm [shape: f32[2,72], index: 8, kind: output, shape index: {}]  }
   0x1   :  { %14 = vsyncpa [#allocation6], 0 }
   0x2   :  { %15 = vsyncpa [#allocation9], 0 }
   0x3   :  { %16 = vsyncpa [#allocation4], 0  ;;  %s899_s27 = smov [#allocation5]   ;;  %s900_s29 = smov [#allocation8]  }
   0x4   :  { %s34_s28 = sshll.u32 %s899_s27, 4  ;;  %s62_s30 = sshll.u32 %s900_s29, 4  ;;  %s35_s28 = int_to_ptr.vmem [resolvable:$true] %s34_s28  ;;  %s954_s30 = int_to_ptr.vmem [resolvable:$true] %s62_s30 }
   0x5   :  { %s759_s11 = scalar_lea.hbm %s1078_s1, 512 }
   0x6   :  { %p760_p0 = scmp.ne.s32.totalorder %s1078_s1, %s759_s11  ;;  %p763_p1 = scmp.lt.u32.totalorder %s759_s11, %s1078_s1 }
   0x8   :  { %p765_p2 = pnand %p763_p1, %p760_p0 }
   0xa   :  { %768 = shalt.err (!%p765_p2)
}
   0xb   :  { %s769_s16 = scalar_lea.vmem %s35_s28, 512  ;;  %p774_p4 = scmp.lt.s32.totalorder %s35_s28, %s35_s28 }
   0xc   :  { %p770_p3 = scmp.ne.s32.totalorder %s35_s28, %s769_s16  ;;  %p775_p5 = scmp.lt.s32.totalorder %s769_s16, %s769_s16 }
   0xe   :  { %p776_p6 = por %p775_p5, %p774_p4 }
  0x10   :  { %p777_p7 = pnand %p776_p6, %p770_p3 }
  0x12   :  { %780 = shalt.err (!%p777_p7)
}
  0x13   :  { %s901_s17 = smov 128   ;;  %s902_s18 = smov 8  }
  0x14   :  { %40 = dma.hbm_to_vmem [thread:$0]  %s1078_s1, 512, %s35_s28, [#allocation6], %s901_s17, %s901_s17, %s902_s18  }
  0x15   :  { %s781_s23 = scalar_lea.hbm %s1082_s5, 768 }
  0x16   :  { %p782_p8 = scmp.ne.s32.totalorder %s1082_s5, %s781_s23  ;;  %p785_p9 = scmp.lt.u32.totalorder %s781_s23, %s1082_s5 }
  0x18   :  { %p787_p10 = pnand %p785_p9, %p782_p8 }
  0x1a   :  { %790 = shalt.err (!%p787_p10)
}
  0x1b   :  { %s791_s29 = scalar_lea.vmem %s954_s30, 768  ;;  %p796_p12 = scmp.lt.s32.totalorder %s954_s30, %s954_s30 }
  0x1c   :  { %p792_p11 = scmp.ne.s32.totalorder %s954_s30, %s791_s29  ;;  %p797_p13 = scmp.lt.s32.totalorder %s791_s29, %s791_s29 }
  0x1e   :  { %p798_p0 = por %p797_p13, %p796_p12 }
  0x20   :  { %p799_p1 = pnand %p798_p0, %p792_p11 }
  0x22   :  { %802 = shalt.err (!%p799_p1)
}
  0x23   :  { %68 = dma.hbm_to_vmem [thread:$0]  %s1082_s5, 768, %s954_s30, [#allocation9], %s901_s17, %s901_s17, %s902_s18  }
  0x24   :  { %s903_s9 = smov [#allocation2]   ;;  %s904_s11 = smov [#allocation7]  }
  0x25   :  { %s22_s10 = sshll.u32 %s903_s9, 4  ;;  %s48_s12 = sshll.u32 %s904_s11, 4  ;;  %s23_s10 = int_to_ptr.vmem [resolvable:$true] %s22_s10  ;;  %s991_s12 = int_to_ptr.vmem [resolvable:$true] %s48_s12 }
  0x26   :  { %s803_s15 = scalar_lea.hbm %s1077_s0, 256 }
  0x27   :  { %p804_p2 = scmp.ne.s32.totalorder %s1077_s0, %s803_s15  ;;  %p807_p3 = scmp.lt.u32.totalorder %s803_s15, %s1077_s0 }
  0x29   :  { %p809_p4 = pnand %p807_p3, %p804_p2 }
  0x2b   :  { %812 = shalt.err (!%p809_p4)
}
  0x2c   :  { %s813_s5 = scalar_lea.vmem %s23_s10, 256  ;;  %p818_p6 = scmp.lt.s32.totalorder %s23_s10, %s23_s10 }
  0x2d   :  { %p814_p5 = scmp.ne.s32.totalorder %s23_s10, %s813_s5  ;;  %p819_p7 = scmp.lt.s32.totalorder %s813_s5, %s813_s5 }
  0x2f   :  { %p820_p8 = por %p819_p7, %p818_p6 }
  0x31   :  { %p821_p9 = pnand %p820_p8, %p814_p5 }
  0x33   :  { %824 = shalt.err (!%p821_p9)
}
  0x34   :  { %28 = dma.hbm_to_vmem [thread:$0]  %s1077_s0, 256, %s23_s10, [#allocation3], %s901_s17, %s901_s17, %s902_s18  }
  0x35   :  { %s825_s25 = scalar_lea.hbm %s1080_s3, 512 }
  0x36   :  { %p826_p10 = scmp.ne.s32.totalorder %s1080_s3, %s825_s25  ;;  %p829_p11 = scmp.lt.u32.totalorder %s825_s25, %s1080_s3 }
  0x38   :  { %p831_p12 = pnand %p829_p11, %p826_p10 }
  0x3a   :  { %834 = shalt.err (!%p831_p12)
}
  0x3b   :  { %s835_s28 = scalar_lea.vmem %s991_s12, 512  ;;  %p840_p0 = scmp.lt.s32.totalorder %s991_s12, %s991_s12 }
  0x3c   :  { %p836_p13 = scmp.ne.s32.totalorder %s991_s12, %s835_s28  ;;  %p841_p1 = scmp.lt.s32.totalorder %s835_s28, %s835_s28 }
  0x3e   :  { %p842_p2 = por %p841_p1, %p840_p0 }
  0x40   :  { %p843_p3 = pnand %p842_p2, %p836_p13 }
  0x42   :  { %846 = shalt.err (!%p843_p3)
}
  0x43   :  { %54 = dma.hbm_to_vmem [thread:$0]  %s1080_s3, 512, %s991_s12, [#allocation6], %s901_s17, %s901_s17, %s902_s18  }
  0x44   :  { %s905_s10 = smov [#allocation10]   ;;  %s847_s15 = scalar_lea.hbm %s1084_s7, 1024 }
  0x45   :  { %s76_s11 = sshll.u32 %s905_s10, 4  ;;  %p848_p4 = scmp.ne.s32.totalorder %s1084_s7, %s847_s15  ;;  %s77_s11 = int_to_ptr.vmem [resolvable:$true] %s76_s11 }
  0x46   :  { %p851_p5 = scmp.lt.u32.totalorder %s847_s15, %s1084_s7 }
  0x48   :  { %p853_p6 = pnand %p851_p5, %p848_p4 }
  0x4a   :  { %856 = shalt.err (!%p853_p6)
}
  0x4b   :  { %s857_s5 = scalar_lea.vmem %s77_s11, 1024  ;;  %p862_p8 = scmp.lt.s32.totalorder %s77_s11, %s77_s11 }
  0x4c   :  { %p858_p7 = scmp.ne.s32.totalorder %s77_s11, %s857_s5  ;;  %p863_p9 = scmp.lt.s32.totalorder %s857_s5, %s857_s5 }
  0x4e   :  { %p864_p10 = por %p863_p9, %p862_p8 }
  0x50   :  { %p865_p11 = pnand %p864_p10, %p858_p7 }
  0x52   :  { %868 = shalt.err (!%p865_p11)
}
  0x53   :  { %82 = dma.hbm_to_vmem [thread:$0]  %s1084_s7, 1024, %s77_s11, [#allocation9], %s901_s17, %s901_s17, %s902_s18  }
  0x54   :  { %891 = dma.done.wait [#allocation3], 256  }
  0x55   :  { %892 = vsyncadd [#allocation3], 4294967040 }
  0x56   :  { %893 = dma.done.wait [#allocation6], 1024  }
  0x57   :  { %894 = vsyncadd [#allocation6], 4294966272 }
  0x58   :  { %895 = dma.done.wait [#allocation9], 1792  }
  0x59   :  { %896 = vsyncadd [#allocation9], 4294965504  ;;  %vm118_vm0 = vcmask 1046528   ;;  %vm111_vm1 = vcmask 252928   ;;  %v100_v0 = vld [vmem:[#allocation5] sm:$0xff]  ;;  %v101_v1 = vld [vmem:[#allocation5 + $0x8] sm:$0xff] }
  0x5a   :  { %v102_v2 = vld [vmem:[#allocation5 + $0x10] sm:$0xff]  ;;  %v693_v3 = vpack.c.bf16 %v101_v1, %v100_v0  ;;  %v103_v4 = vld [vmem:[#allocation5 + $0x18] sm:$0x7f]  ;;  %vm906_vm2 = vmmov 1   ;;  %v199_v7 = vld [vmem:[#allocation7] sm:$0xff]  ;;  %vm210_vm4 = vcmask 261120  }
  0x5b   :  { %v98_v5 = vld [vmem:[#allocation2] sm:$0xff]  ;;  %v697_v6 = vpack.c.bf16 %v103_v4, %v102_v2  ;;  %vm698_vm3 = vmpackc.low %vm118_vm0, %vm906_vm2  ;;  %v200_v8 = vld [vmem:[#allocation7 + $0x8] sm:$0xff]  ;;  %vm307_vm5 = vcmask 392192   ;;  %vm399_vm6 = vcmask 523264   ;;  %v907_v56 = vmov 0  }
  0x5c   :  { %645 = vmatprep.mubr.msk.f32.mxu0 %vm111_vm1, %v98_v5  ;;  %694 = vmatprep.subr.bf16.mxu0 %v693_v3  ;;  %v703_v9 = vpack.c.bf16 %v200_v8, %v199_v7  ;;  %v99_v10 = vld [vmem:[#allocation2 + $0x8] sm:$0xff]  ;;  %v201_v11 = vld [vmem:[#allocation7 + $0x10] sm:$0xff]  ;;  %v294_v14 = vld [vmem:[#allocation8] sm:$0xff]  ;;  %vm551_vm7 = vcmask 1041409   ;;  %vm576_vm8 = vcmask 582656  }
  0x5d   :  { %696 = vmatpush3.bf16.msra.mxu0 %v693_v3  ;;  %v202_v12 = vld [vmem:[#allocation7 + $0x18] sm:$0xff]  ;;  %v295_v15 = vld [vmem:[#allocation8 + $0x8] sm:$0xff]  ;;  %v296_v16 = vld [vmem:[#allocation8 + $0x10] sm:$0xff]  ;;  %749 = vset.pattern.permute.xlu0 %v907_v56 }
  0x5e   :  { %699 = vmatprep.subr.msk.bf16.mxu0 %vm698_vm3, %v697_v6  ;;  %704 = vmatprep.subr.bf16.mxu1 %v703_v9  ;;  %v707_v13 = vpack.c.bf16 %v202_v12, %v201_v11  ;;  %v711_v17 = vpack.c.bf16 %v295_v15, %v294_v14  ;;  %v297_v18 = vld [vmem:[#allocation8 + $0x18] sm:$0xff]  ;;  %v595_v20 = vld [vmem:[%s1079_s2] ss:$0 sm:$0xff]  ;;  %v298_v27 = vld [vmem:[#allocation8 + $0x20] sm:$0xff] }
  0x5f   :  { %706 = vmatpush3.bf16.msra.mxu1 %v703_v9  ;;  %v715_v19 = vpack.c.bf16 %v297_v18, %v296_v16  ;;  %v299_v28 = vld [vmem:[#allocation8 + $0x28] sm:$0xff]  ;;  %v391_v30 = vld [vmem:[#allocation10] sm:$0xff]  ;;  %v392_v31 = vld [vmem:[#allocation10 + $0x8] sm:$0xff]  ;;  %750 = vset.pattern.permute.xlu1 %v907_v56 }
  0x60   :  { %708 = vmatprep.subr.bf16.mxu1 %v707_v13  ;;  %v719_v29 = vpack.c.bf16 %v299_v28, %v298_v27  ;;  %v393_v32 = vld [vmem:[#allocation10 + $0x10] sm:$0xff]  ;;  %v723_v33 = vpack.c.bf16 %v392_v31, %v391_v30  ;;  %v394_v34 = vld [vmem:[#allocation10 + $0x18] sm:$0xff]  ;;  %v395_v36 = vld [vmem:[#allocation10 + $0x20] sm:$0xff] }
  0x61   :  { %702 = vmatpush3.bf16.msk.msra.mxu0 %vm698_vm3, %v697_v6  ;;  %v727_v35 = vpack.c.bf16 %v394_v34, %v393_v32  ;;  %v396_v37 = vld [vmem:[#allocation10 + $0x28] sm:$0xff]  ;;  %v599_v39 = vld [vmem:[%s1081_s4] ss:$0 sm:$0xff]  ;;  %v397_v46 = vld [vmem:[#allocation10 + $0x30] sm:$0xff]  ;;  %s908_s4 = smov [#allocation11]  }
  0x62   :  { %712 = vmatprep.subr.bf16.mxu0 %v711_v17  ;;  %v731_v38 = vpack.c.bf16 %v396_v37, %v395_v36  ;;  %v398_v47 = vld [vmem:[#allocation10 + $0x38] sm:$0xff]  ;;  %v602_v49 = vld [vmem:[%s1083_s6] ss:$0 sm:$0xff]  ;;  %s584_s6 = sshll.u32 %s908_s4, 4  ;;  %s585_s6 = int_to_ptr.vmem [resolvable:$true] %s584_s6 }
  0x63   :  { %710 = vmatpush3.bf16.msra.mxu1 %v707_v13  ;;  %v735_v48 = vpack.c.bf16 %v398_v47, %v397_v46  ;;  %s869_s23 = scalar_lea.vmem %s585_s6, 32  ;;  %p874_p13 = scmp.lt.s32.totalorder %s585_s6, %s585_s6 }
  0x64   :  { %646 = vmatmul.mubr.msk.f32.vlgmr.msra.gmra.mrb[0].mxu0 %vm111_vm1, %v99_v10  ;;  %724 = vmatprep.subr.bf16.mxu1 %v723_v33  ;;  %p870_p12 = scmp.ne.s32.totalorder %s585_s6, %s869_s23  ;;  %p875_p0 = scmp.lt.s32.totalorder %s869_s23, %s869_s23 }
  0x65   :  { %714 = vmatpush3.bf16.msra.mxu0 %v711_v17 }
  0x66   :  { %716 = vmatprep.subr.bf16.mxu0 %v715_v19  ;;  %p876_p1 = por %p875_p0, %p874_p13 }
  0x68   :  { %p877_p2 = pnand %p876_p1, %p870_p12 }
  0x69   :  { %718 = vmatpush3.bf16.msra.mxu0 %v715_v19 }
  0x6a   :  { %720 = vmatprep.subr.bf16.mxu0 %v719_v29 }
  0x6d   :  { %722 = vmatpush3.bf16.msra.mxu0 %v719_v29 }
 0x137   :  { %v647_v21 = vpop.f32.mrb[0].mxu0 }
 0x138   :  { %v194_v22 = vadd.f32 %v647_v21, %v595_v20  ;;  %v188_v23 = vpop.f32.mrb[1].mxu0 }
 0x139   :  { %v189_v24 = vadd.f32 %v595_v20, %v188_v23 }
 0x13a   :  { %v198_v26 = vmax.f32 %v194_v22, 0.0 }
 0x13b   :  { %v197_v25 = vmax.f32 %v189_v24, 0.0 }
 0x13d   :  { %656 = vmatprep.mubr.msk.f32.mxu1 %vm210_vm4, %v197_v25 }
 0x13e   :  { %657 = vmatmul.mubr.msk.f32.vlgmr.msra.gmra.mrb[0].mxu1 %vm210_vm4, %v198_v26 }
 0x13f   :  { %726 = vmatpush3.bf16.msra.mxu1 %v723_v33 }
 0x140   :  { %728 = vmatprep.subr.bf16.mxu1 %v727_v35 }
 0x143   :  { %730 = vmatpush3.bf16.msra.mxu1 %v727_v35 }
 0x144   :  { %732 = vmatprep.subr.bf16.mxu1 %v731_v38 }
 0x147   :  { %734 = vmatpush3.bf16.msra.mxu1 %v731_v38 }
 0x148   :  { %736 = vmatprep.subr.bf16.mxu1 %v735_v48 }
 0x14b   :  { %738 = vmatpush3.bf16.msra.mxu1 %v735_v48 }
 0x211   :  { %v658_v40 = vpop.f32.mrb[0].mxu1 }
 0x212   :  { %v289_v41 = vadd.f32 %v658_v40, %v599_v39  ;;  %v283_v42 = vpop.f32.mrb[1].mxu1 }
 0x213   :  { %v284_v43 = vadd.f32 %v599_v39, %v283_v42 }
 0x214   :  { %v293_v45 = vmax.f32 %v289_v41, 0.0 }
 0x215   :  { %v292_v44 = vmax.f32 %v284_v43, 0.0 }
 0x217   :  { %671 = vmatprep.mubr.msk.f32.mxu0 %vm307_vm5, %v292_v44 }
 0x218   :  { %672 = vmatmul.mubr.msk.f32.vlgmr.msra.gmra.mrb[2].mxu0 %vm307_vm5, %v293_v45 }
 0x2eb   :  { %v673_v50 = vpop.f32.mrb[2].mxu0 }
 0x2ec   :  { %v386_v51 = vadd.f32 %v673_v50, %v602_v49  ;;  %v380_v52 = vpop.f32.mrb[3].mxu0 }
 0x2ed   :  { %v381_v53 = vadd.f32 %v602_v49, %v380_v52 }
 0x2ee   :  { %v390_v55 = vmax.f32 %v386_v51, 0.0 }
 0x2ef   :  { %v389_v54 = vmax.f32 %v381_v53, 0.0 }
 0x2f1   :  { %690 = vmatprep.mubr.msk.f32.mxu1 %vm399_vm6, %v389_v54 }
 0x2f2   :  { %691 = vmatmul.mubr.msk.f32.vlgmr.msra.gmra.mrb[2].mxu1 %vm399_vm6, %v390_v55 }
 0x3c5   :  { %v692_v57 = vpop.f32.mrb[2].mxu1 }
 0x3c6   :  { %v488_v58 = vsel %vm399_vm6, %v692_v57, -inf  ;;  %v472_v59 = vpop.f32.mrb[3].mxu1 }
 0x3c7   :  { %v489_v60 = vrot.slane %v488_v58, 4  ;;  %v481_v61 = vsel %vm399_vm6, %v472_v59, -inf }
 0x3c8   :  { %v482_v62 = vrot.slane %v481_v61, 4 }
 0x3c9   :  { %v490_v63 = vmax.f32 %v488_v58, %v489_v60 }
 0x3ca   :  { %v483_v0 = vmax.f32 %v481_v61, %v482_v62 }
 0x3cb   :  { %v491_v1 = vrot.slane %v490_v63, 2 }
 0x3cc   :  { %v484_v2 = vrot.slane %v483_v0, 2 }
 0x3cd   :  { %v492_v3 = vmax.f32 %v490_v63, %v491_v1 }
 0x3ce   :  { %v485_v4 = vmax.f32 %v483_v0, %v484_v2 }
 0x3cf   :  { %v493_v5 = vrot.slane %v492_v3, 1 }
 0x3d0   :  { %v486_v6 = vrot.slane %v485_v4, 1 }
 0x3d1   :  { %v494_v7 = vmax.f32 %v492_v3, %v493_v5 }
 0x3d2   :  { %v487_v8 = vmax.f32 %v485_v4, %v486_v6 }
 0x3d3   :  { %v496_v9 = vsub.f32 %v692_v57, %v494_v7 }
 0x3d4   :  { %v495_v10 = vsub.f32 %v472_v59, %v487_v8 }
 0x3d5   :  { %v499_v11 = vmul.f32 1.442695, %v496_v9 }
 0x3d6   :  { %v497_v12 = vmul.f32 1.442695, %v495_v10 }
 0x3d7   :  { %751 = vpow2.f32 %v499_v11 }
 0x3d8   :  { %753 = vpow2.f32 %v497_v12 }
 0x3e1   :  { %v752_v13 = vpop.eup %751 }
 0x3e2   :  { %v754_v14 = vpop.eup %753  ;;  %v508_v15 = vsel %vm399_vm6, %v752_v13, 0.0  ;;  %v520_v16 = vmul.f32 %v752_v13, %v390_v55 }
 0x3e3   :  { %v509_v17 = vrot.slane %v508_v15, 4  ;;  %v501_v18 = vsel %vm399_vm6, %v754_v14, 0.0  ;;  %v519_v19 = vmul.f32 %v754_v14, %v389_v54  ;;  %v562_v54 = vlaneseq }
 0x3e4   :  { %v502_v20 = vrot.slane %v501_v18, 4  ;;  %v528_v21 = vsel %vm399_vm6, %v520_v16, 0.0 }
 0x3e5   :  { %v510_v22 = vadd.f32 %v509_v17, %v508_v15  ;;  %v521_v23 = vsel %vm399_vm6, %v519_v19, 0.0  ;;  %v529_v24 = vrot.slane %v528_v21, 4  ;;  %v563_v55 = vand.u32 127, %v562_v54 }
 0x3e6   :  { %v503_v25 = vadd.f32 %v502_v20, %v501_v18  ;;  %v522_v26 = vrot.slane %v521_v23, 4  ;;  %v566_v57 = vshrl.u32 %v562_v54, 7 }
 0x3e7   :  { %v511_v27 = vrot.slane %v510_v22, 2  ;;  %v530_v29 = vadd.f32 %v529_v24, %v528_v21  ;;  %v564_v56 = vadd.s32 4294967232, %v563_v55 }
 0x3e8   :  { %v504_v28 = vrot.slane %v503_v25, 2  ;;  %v523_v31 = vadd.f32 %v522_v26, %v521_v23 }
 0x3e9   :  { %v512_v30 = vadd.f32 %v511_v27, %v510_v22  ;;  %v531_v35 = vrot.slane %v530_v29, 2  ;;  %v567_v59 = vsub.s32 %v564_v56, %v566_v57 }
 0x3ea   :  { %v505_v32 = vadd.f32 %v504_v28, %v503_v25  ;;  %v524_v37 = vrot.slane %v523_v31, 2 }
 0x3eb   :  { %v513_v33 = vrot.slane %v512_v30, 1  ;;  %v532_v39 = vadd.f32 %v531_v35, %v530_v29 }
 0x3ec   :  { %v506_v34 = vrot.slane %v505_v32, 1  ;;  %v525_v40 = vadd.f32 %v524_v37, %v523_v31 }
 0x3ed   :  { %v514_v36 = vadd.f32 %v513_v33, %v512_v30  ;;  %v533_v41 = vrot.slane %v532_v39, 1 }
 0x3ee   :  { %v507_v38 = vadd.f32 %v506_v34, %v505_v32  ;;  %v526_v42 = vrot.slane %v525_v40, 1 }
 0x3ef   :  { %755 = vrcp.f32 %v514_v36  ;;  %v534_v43 = vadd.f32 %v533_v41, %v532_v39 }
 0x3f0   :  { %757 = vrcp.f32 %v507_v38  ;;  %v527_v45 = vadd.f32 %v526_v42, %v525_v40 }
 0x3f9   :  { %v756_v44 = vpop.eup %755 }
 0x3fa   :  { %v758_v46 = vpop.eup %757  ;;  %v536_v47 = vmul.f32 %v756_v44, %v534_v43 }
 0x3fb   :  { %539 = vperm.xlu0 %749, %v758_v46   ;;  %v535_v48 = vmul.f32 %v758_v46, %v527_v45 }
 0x3fd   :  { %v552_v49 = vsel %vm551_vm7, %v536_v47, %v535_v48 }
 0x3ff   :  { %544 = vperm.xlu0 %749, %v756_v44  }
 0x47a   :  { %v540_v50 = vpop.permute.xlu0 %539 }
 0x47b   :  { %v547_v51 = vmul.f32 %v754_v14, %v540_v50 }
 0x47d   :  { %557 = vperm.xlu1 %750, %v547_v51  }
 0x47e   :  { %v545_v52 = vpop.permute.xlu0 %544 }
 0x47f   :  { %v548_v53 = vmul.f32 %v752_v13, %v545_v52 }
 0x481   :  { %560 = vperm.xlu1 %750, %v548_v53  }
 0x4fc   :  { %v558_v58 = vpop.permute.xlu1 %557 }
 0x4fd   :  { %v568_v61 = vrot.slane %v558_v58, %v567_v59 }
 0x500   :  { %v561_v60 = vpop.permute.xlu1 %560 }
 0x501   :  { %v572_v62 = vrot.slane %v561_v60, %v567_v59 }
 0x503   :  { %v573_v63 = vsel %vm551_vm7, %v572_v62, %v568_v61 }
 0x504   :  { %v575_v0 = vsel %vm399_vm6, %v552_v49, %v573_v63 }
 0x505   :  { %577 = vst.msk [vmem:[#allocation11] sm:$0x3] %vm576_vm8, %v575_v0 }
 0x506   :  { %880 = shalt.err (!%p877_p2)
}
 0x507   :  { %s881_s26 = scalar_lea.hbm %s1085_s8, 32 }
 0x508   :  { %p882_p3 = scmp.ne.s32.totalorder %s1085_s8, %s881_s26  ;;  %p885_p4 = scmp.lt.u32.totalorder %s881_s26, %s1085_s8 }
 0x50a   :  { %p887_p5 = pnand %p885_p4, %p882_p3 }
 0x50c   :  { %890 = shalt.err (!%p887_p5)
}
 0x50d   :  { %587 = dma.vmem_to_hbm [thread:$0]  %s585_s6, 32, %s1085_s8, [#allocation4]  }
 0x50e   :  { %897 = dma.done.wait [#allocation4], 32  }
 0x50f   :  { %898 = vsyncadd [#allocation4], 4294967264 }
 0x510   :  { %591 = vsyncpa [#allocation3], 1 }
 0x511   :  { %592 = vsyncpa [#allocation6], 1 }
 0x512   :  { %593 = vsyncpa [#allocation9], 1 }
 0x513   :  { %594 = vsyncpa [#allocation4], 1 }

</bundles_post_ra>
